<compile_context>
chip_gen: v5e
topology: v5e:2x2
jax: 0.10.0
libtpu: 0.0.40
codegen_flags: <defaults>
</compile_context>

<pallas_src>
import jax
import jax.numpy as jnp
from jax import lax
from jax.experimental import pallas as pl
from jax.experimental.pallas import tpu as pltpu


def _round_up(v, m):
    return ((v + m - 1) // m) * m


def _linear_kernel(x_ref, w_ref, o_ref, acc_ref):
    # x_ref:   (tm, tk)  tile of the batch (K in original layout)
    # w_ref:   (tn, tk)  tile of the weight in its original (out, in) layout
    # o_ref:   (tm, tn)  output tile
    # acc_ref: (tm, tn)  f32 accumulator, resident across the K grid axis
    @pl.when(pl.program_id(2) == 0)
    def _():
        acc_ref[...] = jnp.zeros_like(acc_ref)

    # Contract K against K directly; MXU handles the "transposed" contraction natively.
    acc_ref[...] += lax.dot_general(
        x_ref[...],
        w_ref[...],
        dimension_numbers=(((1,), (1,)), ((), ())),
        preferred_element_type=jnp.float32,
    )

    @pl.when(pl.program_id(2) == pl.num_programs(2) - 1)
    def _():
        o_ref[...] = acc_ref[...].astype(o_ref.dtype)


def category_encoder(x, weight, *, tm=256, tn=256, tk=512):
    """y = x @ weight.T  (nn.Linear with bias=False).

    x:      (batch, in_size)    float32 (or bf16)
    weight: (out_size, in_size) float32 (or bf16), PyTorch nn.Linear layout
    returns (batch, out_size) in x.dtype
    """
    batch, in_size = x.shape
    out_size, k2 = weight.shape
    assert k2 == in_size, "weight must be (out_size, in_size)"

    # Effective tile sizes: full dim when small, otherwise the (MXU/lane-friendly)
    # defaults. Defaults are multiples of (8, 128) so BlockSpec constraints hold.
    if batch <= tm:
        tm_e, mp = batch, batch
    else:
        tm_e, mp = tm, _round_up(batch, tm)
    if out_size <= tn:
        tn_e, np_ = out_size, out_size
    else:
        tn_e, np_ = tn, _round_up(out_size, tn)
    if in_size <= tk:
        tk_e, kp = in_size, in_size
    else:
        tk_e, kp = tk, _round_up(in_size, tk)

    # Zero-pad only if needed (zero padding along K is exact; M/N padding is sliced off).
    xp = x
    wp = weight
    if (mp, kp) != (batch, in_size):
        xp = jnp.pad(x, ((0, mp - batch), (0, kp - in_size)))
    if (np_, kp) != (out_size, in_size):
        wp = jnp.pad(weight, ((0, np_ - out_size), (0, kp - in_size)))

    grid = (mp // tm_e, np_ // tn_e, kp // tk_e)

    itemsize = jnp.dtype(x.dtype).itemsize
    # Double-buffered input/output tiles + f32 accumulator, with headroom; keep well
    # under v7x's 64 MiB physical VMEM.
    vmem_est = (
        2 * (tm_e * tk_e + tn_e * tk_e + tm_e * tn_e) * itemsize
        + tm_e * tn_e * 4
    )
    vmem_limit = min(max(2 * vmem_est + (8 << 20), 32 << 20), 56 << 20)

    cost = pl.CostEstimate(
        flops=2 * mp * np_ * kp,
        transcendentals=0,
        bytes_accessed=(mp * kp + np_ * kp) * itemsize + mp * np_ * itemsize,
    )

    out = pl.pallas_call(
        _linear_kernel,
        out_shape=jax.ShapeDtypeStruct((mp, np_), x.dtype),
        grid_spec=pltpu.PrefetchScalarGridSpec(
            num_scalar_prefetch=0,
            grid=grid,
            in_specs=[
                # x tile: (tm, tk)
                pl.BlockSpec((tm_e, tk_e), lambda i, j, k: (i, k)),
                # weight tile in original (out, in) layout: (tn, tk)
                pl.BlockSpec((tn_e, tk_e), lambda i, j, k: (j, k)),
            ],
            out_specs=pl.BlockSpec((tm_e, tn_e), lambda i, j, k: (i, j)),
            scratch_shapes=[pltpu.VMEM((tm_e, tn_e), jnp.float32)],
        ),
        compiler_params=pltpu.CompilerParams(
            dimension_semantics=("parallel", "parallel", "arbitrary"),
            vmem_limit_bytes=int(vmem_limit),
        ),
        cost_estimate=cost,
    )(xp, wp)

    if (mp, np_) != (batch, out_size):
        out = out[:batch, :out_size]
    return out


if __name__ == "__main__":
    # Small shapes consistent with the module: a batch of one-hot category vectors.
    cat_count = 32      # in_size
    vector_size = 128   # out_size (module default)
    batch = 8

    key = jax.random.PRNGKey(0)
    k_w, k_idx = jax.random.split(key)

    # Deterministic parameter init (synthetic, not a checkpoint).
    weight = jax.random.normal(k_w, (vector_size, cat_count), dtype=jnp.float32) * 0.1

    # One-hot inputs (what the module is designed for).
    idx = jax.random.randint(k_idx, (batch,), 0, cat_count)
    x = jax.nn.one_hot(idx, cat_count, dtype=jnp.float32)

    y = category_encoder(x, weight)
    y = jax.block_until_ready(y)

    # Sanity check against plain JAX reference (one-hot selects weight columns).
    ref = x @ weight.T
    assert y.shape == (batch, vector_size)
    assert jnp.max(jnp.abs(y - ref)) < 1e-5

    # Also exercise a larger / ragged shape to cover the tiled + padded path.
    k_x2, k_w2 = jax.random.split(k_idx)
    x2 = jax.random.normal(k_x2, (300, 1000), dtype=jnp.float32)
    w2 = jax.random.normal(k_w2, (384, 1000), dtype=jnp.float32) * 0.05
    y2 = jax.block_until_ready(category_encoder(x2, w2))
    ref2 = x2 @ w2.T
    assert y2.shape == (300, 384)
    assert jnp.max(jnp.abs(y2 - ref2)) < 1e-2  # f32 accumulation, loose abs tol

    print("KERNEL_OK")
</pallas_src>

<mosaic_0001>
module attributes {stable_mosaic.version = 11 : i64} {
  func.func @_linear_kernel(%arg0: i32, %arg1: i32, %arg2: i32, %arg3: memref<8x32xf32, #tpu.memory_space<vmem>>, %arg4: memref<128x32xf32, #tpu.memory_space<vmem>>, %arg5: memref<8x128xf32, #tpu.memory_space<vmem>>, %arg6: memref<8x128xf32, #tpu.memory_space<vmem>>) attributes {dimension_semantics = [#tpu.dimension_semantics<parallel>, #tpu.dimension_semantics<parallel>, #tpu.dimension_semantics<arbitrary>], iteration_bounds = array<i64: 1, 1, 1>, scalar_prefetch = 0 : i64, scratch_operands = 1 : i64, tpu.core_type = #tpu.core_type<tc>, window_params = [{transform_indices = @transform_0, window_bounds = array<i64: 8, 32>}, {transform_indices = @transform_1, window_bounds = array<i64: 128, 32>}, {transform_indices = @transform_2, window_bounds = array<i64: 8, 128>}]} {
    %c0_i32 = arith.constant 0 : i32
    %0 = arith.cmpi eq, %arg2, %c0_i32 : i32
    %1 = arith.extui %0 : i1 to i32
    %c0_i32_0 = arith.constant 0 : i32
    %2 = arith.cmpi ne, %1, %c0_i32_0 : i32
    scf.if %2 {
      %cst_10 = arith.constant 0.000000e+00 : f32
      %12 = vector.broadcast %cst_10 : f32 to vector<8x128xf32>
      %c0_11 = arith.constant 0 : index
      %c0_12 = arith.constant 0 : index
      %13 = vector.load %arg6[%c0_11, %c0_12] : memref<8x128xf32, #tpu.memory_space<vmem>>, vector<8x128xf32>
      tpu.vector_store %arg6[%c0_11, %c0_12], %12 {strides = array<i32>} : memref<8x128xf32, #tpu.memory_space<vmem>>, vector<8x128xf32>,
    } else {
    }
    %c0 = arith.constant 0 : index
    %c0_1 = arith.constant 0 : index
    %3 = vector.load %arg6[%c0, %c0_1] : memref<8x128xf32, #tpu.memory_space<vmem>>, vector<8x128xf32>
    %c0_2 = arith.constant 0 : index
    %c0_3 = arith.constant 0 : index
    %4 = vector.load %arg3[%c0_2, %c0_3] : memref<8x32xf32, #tpu.memory_space<vmem>>, vector<8x32xf32>
    %c0_4 = arith.constant 0 : index
    %c0_5 = arith.constant 0 : index
    %5 = vector.load %arg4[%c0_4, %c0_5] : memref<128x32xf32, #tpu.memory_space<vmem>>, vector<128x32xf32>
    %cst = arith.constant dense<0.000000e+00> : vector<8x128xf32>
    %6 = tpu.matmul %4, %5, %cst {dimension_numbers = #tpu.dot_dimension_numbers<[1], [1], [0], [0], [0, 0, 1, 0], [], []>} : vector<8x32xf32>, vector<128x32xf32>, vector<8x128xf32> -> vector<8x128xf32>
    %7 = arith.addf %3, %6 : vector<8x128xf32>
    %c0_6 = arith.constant 0 : index
    %c0_7 = arith.constant 0 : index
    %8 = vector.load %arg6[%c0_6, %c0_7] : memref<8x128xf32, #tpu.memory_space<vmem>>, vector<8x128xf32>
    tpu.vector_store %arg6[%c0_6, %c0_7], %7 {strides = array<i32>} : memref<8x128xf32, #tpu.memory_space<vmem>>, vector<8x128xf32>,
    %c0_i32_8 = arith.constant 0 : i32
    %9 = arith.cmpi eq, %arg2, %c0_i32_8 : i32
    %10 = arith.extui %9 : i1 to i32
    %c0_i32_9 = arith.constant 0 : i32
    %11 = arith.cmpi ne, %10, %c0_i32_9 : i32
    scf.if %11 {
      %c0_10 = arith.constant 0 : index
      %c0_11 = arith.constant 0 : index
      %12 = vector.load %arg6[%c0_10, %c0_11] : memref<8x128xf32, #tpu.memory_space<vmem>>, vector<8x128xf32>
      %c0_12 = arith.constant 0 : index
      %c0_13 = arith.constant 0 : index
      %13 = vector.load %arg5[%c0_12, %c0_13] : memref<8x128xf32, #tpu.memory_space<vmem>>, vector<8x128xf32>
      tpu.vector_store %arg5[%c0_12, %c0_13], %12 {strides = array<i32>} : memref<8x128xf32, #tpu.memory_space<vmem>>, vector<8x128xf32>,
    } else {
    }
    return
  }
  func.func @transform_0(%arg0: i32, %arg1: i32, %arg2: i32) -> (i32, i32) {
    %c0_i32 = arith.constant 0 : i32
    return %arg0, %arg2 : i32, i32
  }
  func.func @transform_1(%arg0: i32, %arg1: i32, %arg2: i32) -> (i32, i32) {
    %c0_i32 = arith.constant 0 : i32
    return %arg1, %arg2 : i32, i32
  }
  func.func @transform_2(%arg0: i32, %arg1: i32, %arg2: i32) -> (i32, i32) {
    %c0_i32 = arith.constant 0 : i32
    return %arg0, %arg1 : i32, i32
  }
}

</mosaic_0001>

<bundles_post_ra>
// kernel: tpu_custom_call.1
= control target key start
LH: loop header
LB: loop body
LE: loop exit
PB: predicated region body
PF: predicated region fallthrough
CT: control target
= control target key end

     0   :  { %vm35_vm0 = vcmask 261120   ;;  %s261_s0 = inlined_call_operand.vmem [shape: f32[8,32], index: 0, kind: input, shape index: {}]   ;;  %s262_s1 = inlined_call_operand.vmem [shape: f32[128,32], index: 1, kind: input, shape index: {}]   ;;  %s263_s2 = inlined_call_operand.hbm [shape: f32[8,128], index: 2, kind: output, shape index: {}]  }
   0x1   :  { %v34_v0 = vld [vmem:[%s262_s1 + $0x78] sm:$0xff]  ;;  %v33_v1 = vld [vmem:[%s262_s1 + $0x70] sm:$0xff] }
   0x2   :  { %130 = vmatpush.xpose.msk.msra.mxu0 %vm35_vm0, %v34_v0 }
   0x3   :  { %7 = vsyncpa [#allocation4], 0  ;;  %v32_v2 = vld [vmem:[%s262_s1 + $0x68] sm:$0xff]  ;;  %v31_v3 = vld [vmem:[%s262_s1 + $0x60] sm:$0xff]  ;;  %s174_s15 = smov [#allocation3]   ;;  %s121_s19 = sshll.u32 %s263_s2, 4  ;;  %s122_s19 = int_to_ptr.hbm [resolvable:$true] %s121_s19 }
   0x4   :  { %v30_v4 = vld [vmem:[%s262_s1 + $0x58] sm:$0xff]  ;;  %v29_v5 = vld [vmem:[%s262_s1 + $0x50] sm:$0xff]  ;;  %v28_v6 = vld [vmem:[%s262_s1 + $0x48] sm:$0xff]  ;;  %s119_s16 = sshll.u32 %s174_s15, 4  ;;  %s120_s16 = int_to_ptr.vmem [resolvable:$true] %s119_s16 }
   0x5   :  { %v27_v7 = vld [vmem:[%s262_s1 + $0x40] sm:$0xff]  ;;  %v26_v8 = vld [vmem:[%s262_s1 + $0x38] sm:$0xff]  ;;  %v25_v9 = vld [vmem:[%s262_s1 + $0x30] sm:$0xff] }
   0x6   :  { %131 = vmatpush.xpose.msk.msra.mxu0 %vm35_vm0, %v33_v1  ;;  %v24_v10 = vld [vmem:[%s262_s1 + $0x28] sm:$0xff]  ;;  %v23_v11 = vld [vmem:[%s262_s1 + $0x20] sm:$0xff]  ;;  %v22_v12 = vld [vmem:[%s262_s1 + $0x18] sm:$0xff] }
   0x7   :  { %v21_v13 = vld [vmem:[%s262_s1 + $0x10] sm:$0xff]  ;;  %v20_v14 = vld [vmem:[%s262_s1 + $0x8] sm:$0xff]  ;;  %v19_v15 = vld [vmem:[%s262_s1] sm:$0xff] }
   0x8   :  { %v18_v16 = vld [vmem:[%s261_s0] sm:$0xff] }
   0xa   :  { %132 = vmatpush.xpose.msk.msra.mxu0 %vm35_vm0, %v32_v2 }
   0xe   :  { %133 = vmatpush.xpose.msk.msra.mxu0 %vm35_vm0, %v31_v3 }
  0x12   :  { %134 = vmatpush.xpose.msk.msra.mxu0 %vm35_vm0, %v30_v4 }
  0x16   :  { %135 = vmatpush.xpose.msk.msra.mxu0 %vm35_vm0, %v29_v5 }
  0x1a   :  { %136 = vmatpush.xpose.msk.msra.mxu0 %vm35_vm0, %v28_v6 }
  0x1e   :  { %137 = vmatpush.xpose.msk.msra.mxu0 %vm35_vm0, %v27_v7 }
  0x22   :  { %138 = vmatpush.xpose.msk.msra.mxu0 %vm35_vm0, %v26_v8 }
  0x26   :  { %139 = vmatpush.xpose.msk.msra.mxu0 %vm35_vm0, %v25_v9 }
  0x2a   :  { %140 = vmatpush.xpose.msk.msra.mxu0 %vm35_vm0, %v24_v10 }
  0x2e   :  { %141 = vmatpush.xpose.msk.msra.mxu0 %vm35_vm0, %v23_v11 }
  0x32   :  { %142 = vmatpush.xpose.msk.msra.mxu0 %vm35_vm0, %v22_v12 }
  0x36   :  { %143 = vmatpush.xpose.msk.msra.mxu0 %vm35_vm0, %v21_v13 }
  0x3a   :  { %144 = vmatpush.xpose.msk.msra.mxu0 %vm35_vm0, %v20_v14 }
  0x3e   :  { %145 = vmatpush.xpose.msk.msra.mxu0 %vm35_vm0, %v19_v15 }
  0x41   :  { %146 = vmatmul.msk.f32.vlgmr.msra.gmra.mxu0 %vm35_vm0, %v18_v16 }
  0xbe   :  { %v104_v17 = vpop.f32.mrf.mxu0 }
  0xbf   :  { %113 = vst [vmem:[#allocation3] sm:$0xff] %v104_v17 }
  0xc0   :  { %124 = dma.vmem_to_hbm [thread:$0]  %s120_s16, 128, %s122_s19, [#allocation4]  }
  0xc1   :  { %172 = dma.done.wait [#allocation4], 128  }
  0xc2   :  { %173 = vsyncadd [#allocation4], 4294967168 }
  0xc3   :  { %129 = vsyncpa [#allocation4], 1 }

</bundles_post_ra>
